<compile_context>
chip_gen: v7x
topology: tpu7x:2x2x1
jax: 0.10.0
libtpu: 0.0.40
codegen_flags: <defaults>
</compile_context>

<pallas_src>
import functools

import jax
import jax.numpy as jnp
from jax.experimental import pallas as pl
from jax.experimental.pallas import tpu as pltpu


def convbn_kernel(x_ref, w_ref, bias_ref, o_ref):
    """One grid step = Bt fused depth/batch slices.

    x_ref:    (Bt, Ho, 3*W*Cin)       im2col-in-H packed activations (H-stride folded)
    w_ref:    (3*W*Cin, Npad)         banded weights (kh/kw taps, W zero-padding,
                                      W-stride and BN scale folded in)
    bias_ref: (1, Npad)               fused BN bias (f32), tiled over Wo
    o_ref:    (Bt, Ho, Npad)          lane-dense output (Npad multiple of 128)
    """
    bt, ho, n = o_ref.shape
    k = w_ref.shape[0]

    # Single MXU matmul (K = 3*W*Cin), f32 accumulation.
    lhs = x_ref[...].reshape(bt * ho, k)
    acc = jnp.dot(lhs, w_ref[...], preferred_element_type=jnp.float32)

    # Fused BatchNorm bias (scale folded into the weights) + ReLU, f32 epilogue.
    y = jnp.maximum(acc + bias_ref[...], 0.0)
    o_ref[...] = y.reshape(bt, ho, n).astype(o_ref.dtype)


def _vmem_limit_bytes():
    """Scoped VMEM limit: 3/4 of physical capacity, capped at 96 MiB (v5e/v6e),
    conservative 64 MiB (v7x per-core) fallback if the query is unavailable."""
    cap = None
    try:
        cap = getattr(pltpu.get_tpu_info(), "vmem_capacity_bytes", None)
    except Exception:
        cap = None
    if not cap:
        cap = 64 * 1024 * 1024
    return int(min(cap * 3 // 4, 96 * 1024 * 1024))


def _pick_block_batch(B, per_bt_bytes, budget_bytes):
    """Largest divisor of B whose block (incl. temporaries) fits the budget,
    preferring >= 4 grid steps (v7x 2-TC balance + pipelining), then >= 2."""
    divisors = [d for d in range(1, B + 1) if B % d == 0]
    fitting = [d for d in divisors if d * per_bt_bytes <= budget_bytes]
    if not fitting:
        return 1
    many = [d for d in fitting if B // d >= 4]
    if many:
        return max(many)
    multi = [d for d in fitting if B // d >= 2]
    if multi:
        return max(multi)
    return max(fitting)


def convbn_pallas(x_im2col, w_band, bias_packed, out_dtype):
    """x_im2col: (B, Ho, 3*W*Cin); w_band: (3*W*Cin, Npad); bias: (1, Npad)."""
    B, Ho, K3 = x_im2col.shape
    Npad = w_band.shape[1]

    vmem_limit = _vmem_limit_bytes()
    in_it = x_im2col.dtype.itemsize
    out_it = jnp.dtype(out_dtype).itemsize
    # Per-Bt bytes: double-buffered input + output blocks, f32 accumulator,
    # f32 epilogue temp and a worst-case in-kernel LHS reshape copy.
    per_bt = (2 * Ho * K3 * in_it
              + 2 * Ho * Npad * out_it
              + 2 * Ho * Npad * 4
              + Ho * K3 * in_it)
    # Resident weights + bias (double-buffered allocation) come out of the budget.
    fixed = 2 * (K3 * Npad * w_band.dtype.itemsize + Npad * 4)
    budget = max(vmem_limit // 2 - fixed, per_bt)
    bt = _pick_block_batch(B, per_bt, budget)

    return pl.pallas_call(
        convbn_kernel,
        out_shape=jax.ShapeDtypeStruct((B, Ho, Npad), out_dtype),
        grid_spec=pltpu.PrefetchScalarGridSpec(
            num_scalar_prefetch=0,
            grid=(B // bt,),
            in_specs=[
                pl.BlockSpec((bt, Ho, K3), lambda b: (b, 0, 0)),
                pl.BlockSpec((K3, Npad), lambda b: (0, 0)),
                pl.BlockSpec((1, Npad), lambda b: (0, 0)),
            ],
            out_specs=pl.BlockSpec((bt, Ho, Npad), lambda b: (b, 0, 0)),
        ),
        compiler_params=pltpu.CompilerParams(
            dimension_semantics=("parallel",),
            vmem_limit_bytes=vmem_limit,
        ),
    )(x_im2col, w_band, bias_packed)


def convbn_forward(x_ncdhw, w_oi133, gamma, beta, running_mean, running_var,
                   stride=(1, 1, 1), eps=1e-5, compute_dtype=jnp.bfloat16):
    """Full Convbn forward.  x_ncdhw: (N, Cin, D, H, W) as in PyTorch."""
    if isinstance(stride, int):
        stride = (stride, stride, stride)
    sd, sh, sw = stride

    N, Cin, D, H, W = x_ncdhw.shape
    Cout = w_oi133.shape[0]
    Ho = (H - 1) // sh + 1                       # padding=1, kernel=3
    Wo = (W - 1) // sw + 1

    # Depth kernel is 1 -> depth stride is plain subsampling of depth slices.
    x = x_ncdhw[:, :, ::sd]
    Dp = x.shape[2]
    B = N * Dp

    # NCDHW -> lane-packed (B, H, W*Cin), cast to compute dtype, pad H by 1, then
    # im2col-in-H with the H-stride folded in: row h gathers padded rows
    # sh*h, sh*h+1, sh*h+2 -> (B, Ho, 3*W*Cin).  (The W zero-padding / W-stride is
    # folded into the banded weight below, so no W pad and no wasted lanes.)
    # TODO(synk): with CompilerParams(allow_input_fusion=...) this packing pass could
    # fuse into the pallas_call prologue; kept as a plain XLA fusion for portability.
    xt = jnp.transpose(x, (0, 2, 3, 4, 1)).reshape(B, H, W * Cin)
    if compute_dtype is not None:
        xt = xt.astype(compute_dtype)
    xp = jnp.pad(xt, ((0, 0), (1, 1), (0, 0)))
    cols = [xp[:, kh: kh + sh * (Ho - 1) + 1: sh, :] for kh in range(3)]
    x_im2col = jnp.concatenate(cols, axis=-1)    # (B, Ho, 3*W*Cin)

    # Fuse BatchNorm3d (inference / running-stats form): fold scale into the conv
    # weights, keep the bias for the kernel epilogue.
    # TODO(synk): PyTorch's default .train() BatchNorm uses batch statistics; the
    # eval-mode running-stats affine is fused here.
    inv_std = 1.0 / jnp.sqrt(running_var + eps)
    scale = gamma * inv_std                      # (Cout,)
    bias = beta - running_mean * scale           # (Cout,)

    # (Cout, Cin, 1, 3, 3) -> (kh, kw, Cin, Cout), BN scale folded in.
    w3 = jnp.transpose(w_oi133[:, :, 0], (2, 3, 1, 0)) * scale

    # Banded weight matrix: M[kh*W*Cin + w_in*Cin + ci, w_out*Cout + co] =
    # w3[kh, kw, ci, co] with kw = w_in - sw*w_out + 1, zero outside the 3-tap band
    # (which is exactly the zero W-padding / W-stride of the conv).
    w_in = jnp.arange(W)[:, None]
    w_out = jnp.arange(Wo)[None, :]
    kw = w_in - sw * w_out + 1                   # (W, Wo)
    valid = (kw >= 0) & (kw <= 2)
    band = w3[:, jnp.clip(kw, 0, 2)]             # (3, W, Wo, Cin, Cout)
    band = jnp.where(valid[None, :, :, None, None], band, 0.0)
    band = jnp.transpose(band, (0, 1, 3, 2, 4)).reshape(3 * W * Cin, Wo * Cout)

    bias_packed = jnp.tile(bias, (Wo,)).reshape(1, Wo * Cout).astype(jnp.float32)

    # Keep the output lane width a multiple of 128 -> unmasked, lane-dense stores.
    Nout = Wo * Cout
    Npad = ((Nout + 127) // 128) * 128
    if Npad != Nout:
        band = jnp.pad(band, ((0, 0), (0, Npad - Nout)))
        bias_packed = jnp.pad(bias_packed, ((0, 0), (0, Npad - Nout)))

    if compute_dtype is not None:
        band = band.astype(compute_dtype)

    out = convbn_pallas(x_im2col, band, bias_packed, x_ncdhw.dtype)  # (B, Ho, Npad)

    if Npad != Nout:
        out = out[:, :, :Nout]
    out = out.reshape(N, Dp, Ho, Wo, Cout)
    # TODO(synk): skip this transpose back to NCDHW when the consumer accepts the
    # channels-last packed layout directly.
    return jnp.transpose(out, (0, 4, 1, 2, 3))   # (N, Cout, D', Ho, Wo)


def convbn_reference(x, w, gamma, beta, mean, var, stride=(1, 1, 1), eps=1e-5):
    """Pure-JAX reference (eval-mode BN)."""
    if isinstance(stride, int):
        stride = (stride,) * 3
    y = jax.lax.conv_general_dilated(
        x, w, window_strides=stride, padding=((0, 0), (1, 1), (1, 1)),
        dimension_numbers=("NCDHW", "OIDHW", "NCDHW"),
        precision=jax.lax.Precision.HIGHEST)
    scale = (gamma / jnp.sqrt(var + eps))[None, :, None, None, None]
    bias = (beta - mean * gamma / jnp.sqrt(var + eps))[None, :, None, None, None]
    return jnp.maximum(y * scale + bias, 0.0)


if __name__ == "__main__":
    key = jax.random.PRNGKey(0)
    k1, k2, k3, k4, k5, k6 = jax.random.split(key, 6)

    # Small shapes consistent with the module: inp=4, oup=8.
    N, Cin, Cout, D, H, W = 2, 4, 8, 3, 16, 16

    x = jax.random.normal(k1, (N, Cin, D, H, W), dtype=jnp.float32)
    w = jax.random.normal(k2, (Cout, Cin, 1, 3, 3), dtype=jnp.float32) * 0.1
    gamma = 1.0 + 0.1 * jax.random.normal(k3, (Cout,), dtype=jnp.float32)
    beta = 0.1 * jax.random.normal(k4, (Cout,), dtype=jnp.float32)
    running_mean = 0.1 * jax.random.normal(k5, (Cout,), dtype=jnp.float32)
    running_var = jnp.abs(1.0 + 0.1 * jax.random.normal(k6, (Cout,), dtype=jnp.float32))

    for stride in [(1, 1, 1), (2, 2, 2)]:
        fwd = jax.jit(functools.partial(convbn_forward, stride=stride))
        out = fwd(x, w, gamma, beta, running_mean, running_var)
        jax.block_until_ready(out)

        ref = convbn_reference(x, w, gamma, beta, running_mean, running_var, stride)
        assert out.shape == ref.shape, (stride, out.shape, ref.shape)
        assert bool(jnp.all(out >= 0.0))                              # ReLU
        # bf16 activations/weights with f32 accumulation vs. HIGHEST-precision f32 ref.
        assert bool(jnp.allclose(out, ref, atol=3e-2, rtol=3e-2)), \
            (stride, float(jnp.max(jnp.abs(out - ref))))
    print("KERNEL_OK")
</pallas_src>

<mosaic_0001>
module attributes {stable_mosaic.version = 11 : i64} {
  func.func @convbn_kernel(%arg0: i32, %arg1: memref<1x16x192xbf16, #tpu.memory_space<vmem>>, %arg2: memref<192x128xbf16, #tpu.memory_space<vmem>>, %arg3: memref<1x128xf32, #tpu.memory_space<vmem>>, %arg4: memref<1x16x128xf32, #tpu.memory_space<vmem>>) attributes {dimension_semantics = [#tpu.dimension_semantics<parallel>], iteration_bounds = array<i64: 6>, scalar_prefetch = 0 : i64, scratch_operands = 0 : i64, tpu.core_type = #tpu.core_type<tc>, window_params = [{transform_indices = @transform_0, window_bounds = array<i64: 1, 16, 192>}, {pipeline_mode = #tpu.pipeline_mode<synchronous>, transform_indices = @transform_1, window_bounds = array<i64: 192, 128>}, {pipeline_mode = #tpu.pipeline_mode<synchronous>, transform_indices = @transform_2, window_bounds = array<i64: 1, 128>}, {transform_indices = @transform_3, window_bounds = array<i64: 1, 16, 128>}]} {
    %c0 = arith.constant 0 : index
    %c0_0 = arith.constant 0 : index
    %c0_1 = arith.constant 0 : index
    %0 = vector.load %arg1[%c0, %c0_0, %c0_1] : memref<1x16x192xbf16, #tpu.memory_space<vmem>>, vector<1x16x192xbf16>
    %1 = vector.shape_cast %0 : vector<1x16x192xbf16> to vector<16x192xbf16>
    %c0_2 = arith.constant 0 : index
    %c0_3 = arith.constant 0 : index
    %2 = vector.load %arg2[%c0_2, %c0_3] : memref<192x128xbf16, #tpu.memory_space<vmem>>, vector<192x128xbf16>
    %cst = arith.constant dense<0.000000e+00> : vector<16x128xf32>
    %3 = tpu.matmul %1, %2, %cst {dimension_numbers = #tpu.dot_dimension_numbers<[1], [0], [0], [1], [0, 0, 1, 1], [], []>} : vector<16x192xbf16>, vector<192x128xbf16>, vector<16x128xf32> -> vector<16x128xf32>
    %c0_4 = arith.constant 0 : index
    %c0_5 = arith.constant 0 : index
    %4 = vector.load %arg3[%c0_4, %c0_5] : memref<1x128xf32, #tpu.memory_space<vmem>>, vector<1x128xf32>
    %5 = vector.broadcast %4 : vector<1x128xf32> to vector<16x128xf32>
    %6 = arith.addf %3, %5 : vector<16x128xf32>
    %cst_6 = arith.constant 0.000000e+00 : f32
    %7 = vector.broadcast %cst_6 : f32 to vector<16x128xf32>
    %8 = arith.maximumf %6, %7 : vector<16x128xf32>
    %9 = vector.shape_cast %8 : vector<16x128xf32> to vector<1x16x128xf32>
    %c0_7 = arith.constant 0 : index
    %c0_8 = arith.constant 0 : index
    %c0_9 = arith.constant 0 : index
    %10 = vector.load %arg4[%c0_7, %c0_8, %c0_9] : memref<1x16x128xf32, #tpu.memory_space<vmem>>, vector<1x16x128xf32>
    tpu.vector_store %arg4[%c0_7, %c0_8, %c0_9], %9 {strides = array<i32>} : memref<1x16x128xf32, #tpu.memory_space<vmem>>, vector<1x16x128xf32>,
    return
  }
  func.func @transform_0(%arg0: i32) -> (i32, i32, i32) {
    %c0_i32 = arith.constant 0 : i32
    %c0_i32_0 = arith.constant 0 : i32
    %c0_i32_1 = arith.constant 0 : i32
    return %arg0, %c0_i32, %c0_i32_0 : i32, i32, i32
  }
  func.func @transform_1(%arg0: i32) -> (i32, i32) {
    %c0_i32 = arith.constant 0 : i32
    %c0_i32_0 = arith.constant 0 : i32
    %c0_i32_1 = arith.constant 0 : i32
    return %c0_i32, %c0_i32_0 : i32, i32
  }
  func.func @transform_2(%arg0: i32) -> (i32, i32) {
    %c0_i32 = arith.constant 0 : i32
    %c0_i32_0 = arith.constant 0 : i32
    %c0_i32_1 = arith.constant 0 : i32
    return %c0_i32, %c0_i32_0 : i32, i32
  }
  func.func @transform_3(%arg0: i32) -> (i32, i32, i32) {
    %c0_i32 = arith.constant 0 : i32
    %c0_i32_0 = arith.constant 0 : i32
    %c0_i32_1 = arith.constant 0 : i32
    return %arg0, %c0_i32, %c0_i32_0 : i32, i32, i32
  }
}

</mosaic_0001>

<bundles_post_ra>
// kernel: tile.8
= control target key start
LH: loop header
LB: loop body
LE: loop exit
PB: predicated region body
PF: predicated region fallthrough
CT: control target
= control target key end

     0   :  { %s28_s0 = inlined_call_operand.vmem [shape: f32[8], index: 0, kind: input, shape index: {}]   ;;  %s29_s1 = inlined_call_operand.vmem [shape: f32[16,8], index: 1, kind: output, shape index: {}]  }
   0x1   :  { %v4_v0 = vld [vmem:[%s28_s0] ss:$0 sm:$0xff] }
   0x2   :  { %5 = vst [vmem:[%s29_s1] sm:$0xff] %v4_v0  ;;  %8 = vst [vmem:[%s29_s1 + $0x8] sm:$0xff] %v4_v0 }

// kernel: tile.9
= control target key start
LH: loop header
LB: loop body
LE: loop exit
PB: predicated region body
PF: predicated region fallthrough
CT: control target
= control target key end

     0   :  { %s131_s10 = smov 120   ;;  %s132_s11 = smov 104   ;;  %vm3_vm0 = vcmask 64512   ;;  %vm9_vm1 = vcmask 1048512   ;;  %vm15_vm2 = vcmask 982912   ;;  %vm21_vm3 = vcmask 917312   ;;  %s207_s0 = inlined_call_operand.vmem [shape: f32[16,8], index: 0, kind: input, shape index: {}]   ;;  %s208_s1 = inlined_call_operand.vmem [shape: f32[1,128], index: 1, kind: output, shape index: {}]  }
   0x1   :  { %v101_v0 = vld [vmem:[%s207_s0 + $0xf] sm:$0x1]   ;;  %v103_v1 = vld [vmem:[%s207_s0 + $0xd] sm:$0x1]   ;;  %v102_v2 = vld [vmem:[%s207_s0 + $0xe] sm:$0x1]  }
   0x2   :  { %7 = vrot.lane.b32.xlu0 %v101_v0, %s131_s10  ;;  %19 = vrot.lane.b32.xlu1 %v103_v1, %s132_s11  ;;  %v104_v3 = vld [vmem:[%s207_s0 + $0xc] sm:$0x1]   ;;  %s133_s16 = smov 112   ;;  %s134_s17 = smov 96   ;;  %v105_v4 = vld [vmem:[%s207_s0 + $0xb] sm:$0x1]  }
   0x3   :  { %v106_v5 = vld [vmem:[%s207_s0 + $0xa] sm:$0x1]   ;;  %v2_v6 = vld [vmem:[%s207_s0] sm:$0x1]   ;;  %s135_s24 = smov 88   ;;  %s136_s25 = smov 80  }
   0x4   :  { %4 = vst.msk [vmem:[#allocation0] sm:$0x1] %vm3_vm0, %v2_v6   ;;  %v107_v7 = vld [vmem:[%s207_s0 + $0x9] sm:$0x1]   ;;  %v108_v8 = vld [vmem:[%s207_s0 + $0x8] sm:$0x1]  }
   0x5   :  { %s137_s30 = smov 72   ;;  %s138_s2 = smov 64   ;;  %v109_v9 = vld [vmem:[%s207_s0 + $0x7] sm:$0x1]   ;;  %v110_v10 = vld [vmem:[%s207_s0 + $0x6] sm:$0x1]  }
   0x6   :  { %13 = vrot.lane.b32.xlu0 %v102_v2, %s133_s16  ;;  %25 = vrot.lane.b32.xlu1 %v104_v3, %s134_s17  ;;  %s139_s7 = smov 56   ;;  %s140_s8 = smov 48   ;;  %v111_v11 = vld [vmem:[%s207_s0 + $0x5] sm:$0x1]   ;;  %v112_v12 = vld [vmem:[%s207_s0 + $0x4] sm:$0x1]  }
   0x7   :  { %s141_s13 = smov 40   ;;  %s142_s14 = smov 32   ;;  %v113_v13 = vld [vmem:[%s207_s0 + $0x3] sm:$0x1]   ;;  %v114_v14 = vld [vmem:[%s207_s0 + $0x2] sm:$0x1]  }
   0x8   :  { %s143_s19 = smov 24   ;;  %s144_s20 = smov 16   ;;  %v115_v15 = vld [vmem:[%s207_s0 + $0x1] sm:$0x1]   ;;  %vm27_vm4 = vcmask 851712   ;;  %vm33_vm5 = vcmask 786112  }
   0x9   :  { %s145_s0 = smov 8   ;;  %vm39_vm6 = vcmask 720512   ;;  %vm45_vm7 = vcmask 654912   ;;  %vm51_vm8 = vcmask 589312   ;;  %vm57_vm9 = vcmask 523712  }
   0xa   :  { %31 = vrot.lane.b32.xlu0 %v105_v4, %s135_s24  ;;  %37 = vrot.lane.b32.xlu1 %v106_v5, %s136_s25  ;;  %vm63_vm10 = vcmask 458112   ;;  %vm69_vm11 = vcmask 392512   ;;  %vm75_vm12 = vcmask 326912   ;;  %vm81_vm13 = vcmask 261312  }
   0xb   :  { %vm87_vm14 = vcmask 195712   ;;  %vm93_vm15 = vcmask 130112  }
   0xe   :  { %43 = vrot.lane.b32.xlu0 %v107_v7, %s137_s30  ;;  %49 = vrot.lane.b32.xlu1 %v108_v8, %s138_s2 }
  0x12   :  { %55 = vrot.lane.b32.xlu0 %v109_v9, %s139_s7  ;;  %61 = vrot.lane.b32.xlu1 %v110_v10, %s140_s8 }
  0x16   :  { %67 = vrot.lane.b32.xlu0 %v111_v11, %s141_s13  ;;  %73 = vrot.lane.b32.xlu1 %v112_v12, %s142_s14 }
  0x1a   :  { %79 = vrot.lane.b32.xlu0 %v113_v13, %s143_s19  ;;  %85 = vrot.lane.b32.xlu1 %v114_v14, %s144_s20 }
  0x1e   :  { %91 = vrot.lane.b32.xlu0 %v115_v15, %s145_s0 }
  0x74   :  { %v8_v16 = vpop.permute.xlu0 %7   ;;  %v20_v17 = vpop.permute.xlu1 %19  }
  0x75   :  { %10 = vst.msk [vmem:[#allocation0] sm:$0x1] %vm9_vm1, %v8_v16  }
  0x78   :  { %v14_v18 = vpop.permute.xlu0 %13   ;;  %v26_v19 = vpop.permute.xlu1 %25  }
  0x79   :  { %16 = vst.msk [vmem:[#allocation0] sm:$0x1] %vm15_vm2, %v14_v18  }
  0x7a   :  { %22 = vst.msk [vmem:[#allocation0] sm:$0x1] %vm21_vm3, %v20_v17  }
  0x7b   :  { %28 = vst.msk [vmem:[#allocation0] sm:$0x1] %vm27_vm4, %v26_v19  }
  0x7c   :  { %v32_v20 = vpop.permute.xlu0 %31   ;;  %v38_v21 = vpop.permute.xlu1 %37  }
  0x7d   :  { %34 = vst.msk [vmem:[#allocation0] sm:$0x1] %vm33_vm5, %v32_v20  }
  0x7e   :  { %40 = vst.msk [vmem:[#allocation0] sm:$0x1] %vm39_vm6, %v38_v21  }
  0x80   :  { %v44_v22 = vpop.permute.xlu0 %43   ;;  %v50_v23 = vpop.permute.xlu1 %49  }
  0x81   :  { %46 = vst.msk [vmem:[#allocation0] sm:$0x1] %vm45_vm7, %v44_v22  }
  0x82   :  { %52 = vst.msk [vmem:[#allocation0] sm:$0x1] %vm51_vm8, %v50_v23  }
  0x84   :  { %v56_v24 = vpop.permute.xlu0 %55   ;;  %v62_v25 = vpop.permute.xlu1 %61  }
  0x85   :  { %58 = vst.msk [vmem:[#allocation0] sm:$0x1] %vm57_vm9, %v56_v24  }
  0x86   :  { %64 = vst.msk [vmem:[#allocation0] sm:$0x1] %vm63_vm10, %v62_v25  }
  0x88   :  { %v68_v26 = vpop.permute.xlu0 %67   ;;  %v74_v27 = vpop.permute.xlu1 %73  }
  0x89   :  { %70 = vst.msk [vmem:[#allocation0] sm:$0x1] %vm69_vm11, %v68_v26  }
  0x8a   :  { %76 = vst.msk [vmem:[#allocation0] sm:$0x1] %vm75_vm12, %v74_v27  }
  0x8c   :  { %v80_v28 = vpop.permute.xlu0 %79   ;;  %v86_v29 = vpop.permute.xlu1 %85  }
  0x8d   :  { %82 = vst.msk [vmem:[#allocation0] sm:$0x1] %vm81_vm13, %v80_v28  }
  0x8e   :  { %88 = vst.msk [vmem:[#allocation0] sm:$0x1] %vm87_vm14, %v86_v29  }
  0x90   :  { %v92_v30 = vpop.permute.xlu0 %91  }
  0x91   :  { %94 = vst.msk [vmem:[#allocation0] sm:$0x1] %vm93_vm15, %v92_v30  }
  0x98   :  { %v98_v31 = vld [vmem:[#allocation0] sm:$0x1] }
  0x99   :  { %100 = vst [vmem:[%s208_s1] sm:$0x1] %v98_v31 }

// kernel: convbn_forward.1
= control target key start
LH: loop header
LB: loop body
LE: loop exit
PB: predicated region body
PF: predicated region fallthrough
CT: control target
= control target key end

     0   :  { %s472_s12 = smov 0   ;;  %s535_s0 = inlined_call_operand.vmem [shape: bf16[6,16,192], index: 0, kind: input, shape index: {}]   ;;  %s536_s1 = inlined_call_operand.vmem [shape: bf16[192,128], index: 1, kind: input, shape index: {}]   ;;  %s537_s2 = inlined_call_operand.vmem [shape: f32[1,128], index: 2, kind: input, shape index: {}]   ;;  %s538_s3 = inlined_call_operand.vmem [shape: f32[6,16,128], index: 3, kind: output, shape index: {}]  }
   0x1 LB: > { %s390_s13 = sadd.s32 4294967295, %s449_s12   ;;  %p394_p0 = scmp.ge.s32.totalorder %s449_s12, 1  ;;  %s449_s12 = sphi %s472_s12, %s13_s12  }
   0x2   : > { %p137_p1 = scmp.lt.s32.totalorder %s449_s12, 7 }
   0x4   : > { %p138_p2 = pnand %p394_p0, %p137_p1 }
   0x5   : > { %v428_v0 = vld [vmem:[%s536_s1] sm:$0xff] (!%p138_p2)   ;;  %v451_v1 = vmov (!%p138_p2), 0   ;;  %p161_p3 = scmp.lt.s32.totalorder (!%p138_p2), %s390_s13, 5  ;;  %v429_v2 = vld [vmem:[%s536_s1 + $0x8] sm:$0xff] (!%p138_p2)   ;;  %v430_v3 = vld [vmem:[%s536_s1 + $0x10] sm:$0xff] (!%p138_p2)   ;;  %vm286_vm0 = vcmask (!%p138_p2), 523264  }
   0x6   : > { %141 = sbr.rel (%p138_p2) target bundleno = 273 (0x111), region = 32  ;;  %290 = vmatprep.subr.bf16.mxu0 (!%p138_p2), %v451_v1  ;;  %v431_v4 = vld [vmem:[%s536_s1 + $0x18] sm:$0xff] (!%p138_p2)   ;;  %v432_v6 = vld [vmem:[%s536_s1 + $0x20] sm:$0xff] (!%p138_p2)   ;;  %v433_v7 = vld [vmem:[%s536_s1 + $0x28] sm:$0xff] (!%p138_p2)  }
   0x7   : > { %291 = vmatpush1.bf16.msra.mxu0 (!%p138_p2), %v428_v0  ;;  %v434_v8 = vld [vmem:[%s536_s1 + $0x30] sm:$0xff] (!%p138_p2)   ;;  %v435_v9 = vld [vmem:[%s536_s1 + $0x38] sm:$0xff] (!%p138_p2)   ;;  %v436_v10 = vld [vmem:[%s536_s1 + $0x40] sm:$0xff] (!%p138_p2)  }
   0x8   : > { %292 = vmatprep.subr.bf16.mxu0 (!%p138_p2), %v451_v1  ;;  %v437_v11 = vld [vmem:[%s536_s1 + $0x48] sm:$0xff] (!%p138_p2)   ;;  %v438_v12 = vld [vmem:[%s536_s1 + $0x50] sm:$0xff] (!%p138_p2)   ;;  %v439_v13 = vld [vmem:[%s536_s1 + $0x58] sm:$0xff] (!%p138_p2)  }
   0x9   : > { %v399_v15 = vld [vmem:[%s537_s2] ss:$0 sm:$0xff] (!%p138_p2) }
   0xb   : > { %293 = vmatpush1.bf16.msra.mxu0 (!%p138_p2), %v429_v2 }
   0xc   : > { %294 = vmatprep.subr.bf16.mxu0 (!%p138_p2), %v451_v1 }
   0xd   : > { %s540_s13 = smov (!%p161_p3, %s390_s13), 5 }
   0xe   : > { %s417_s20 = sshll.u32 %s540_s13, 4 }
   0xf   : > { %295 = vmatpush1.bf16.msra.mxu0 %v430_v3  ;;  %s165_s25 = scalar_lea.vmem %s535_s0, %s417_s20  ;;  %s170_s22 = scalar_lea.vmem %s538_s3, %s417_s20 }
  0x10   : > { %296 = vmatprep.subr.bf16.mxu0 %v451_v1  ;;  %v442_v5 = vld [vmem:[%s165_s25 + $0x4] ss:$8 sps:$4 sm:$0xff]   ;;  %v440_v14 = vld [vmem:[%s165_s25] ss:$8 sps:$4 sm:$0xff]  }
  0x11   : > { %414 = vmatprep.mubr.msk.bf16.mxu0 %vm286_vm0, %v442_v5 }
  0x13   : > { %297 = vmatpush1.bf16.msra.mxu0 %v431_v4 }
  0x14   : > { %298 = vmatprep.subr.bf16.mxu0 %v451_v1 }
  0x17   : > { %299 = vmatpush1.bf16.msra.mxu0 %v432_v6 }
  0x18   : > { %300 = vmatprep.subr.bf16.mxu0 %v451_v1 }
  0x1b   : > { %301 = vmatpush1.bf16.msra.mxu0 %v433_v7 }
  0x1c   : > { %302 = vmatprep.subr.bf16.mxu0 %v451_v1 }
  0x1f   : > { %303 = vmatpush1.bf16.msra.mxu0 %v434_v8 }
  0x20   : > { %304 = vmatprep.subr.bf16.mxu0 %v451_v1 }
  0x23   : > { %305 = vmatpush1.bf16.msra.mxu0 %v435_v9 }
  0x24   : > { %306 = vmatprep.subr.bf16.mxu0 %v451_v1 }
  0x27   : > { %307 = vmatpush1.bf16.msra.mxu0 %v436_v10 }
  0x28   : > { %308 = vmatprep.subr.bf16.mxu0 %v451_v1 }
  0x2b   : > { %309 = vmatpush1.bf16.msra.mxu0 %v437_v11 }
  0x2c   : > { %310 = vmatprep.subr.bf16.mxu0 %v451_v1 }
  0x2f   : > { %311 = vmatpush1.bf16.msra.mxu0 %v438_v12 }
  0x30   : > { %312 = vmatprep.subr.bf16.mxu0 %v451_v1 }
  0x33   : > { %313 = vmatpush1.bf16.msra.mxu0 %v439_v13 }
  0x36   : > { %323 = vmatmul.mubr.bf16.vlgmr.msra.gmra.mrb[0].mxu0 %v440_v14 }
 0x109   : > { %v324_v16 = vpop.f32.mrb[0].mxu0 }
 0x10a   : > { %v325_v17 = vadd.f32 %v399_v15, %v324_v16  ;;  %v326_v18 = vpop.f32.mrb[1].mxu0 }
 0x10b   : > { %v327_v19 = vpop.f32.mrb[2].mxu0 }
 0x10c   : > { %v331_v20 = vmax.f32 %v325_v17, 0.0  ;;  %v328_v21 = vadd.f32 %v399_v15, %v327_v19  ;;  %v329_v22 = vpop.f32.mrb[3].mxu0 }
 0x10e   : > { %333 = vst [vmem:[%s170_s22] sm:$0xff] %v331_v20  ;;  %v332_v23 = vmax.f32 %v328_v21, 0.0 }
 0x110   : > { %334 = vst [vmem:[%s170_s22 + $0x8] sm:$0xff] %v332_v23 }
 0x111 PF: > { %s13_s12 = sadd.s32 1, %s449_s12  }
 0x112   : > { %p10_p4 = scmp.ge.s32.totalorder %s13_s12, 8  }
 0x114   :  { %12 = sbr.rel (!%p10_p4) target bundleno = 1 (0x1), region = 62 }

</bundles_post_ra>
